<compile_context>
chip_gen: v7x
topology: tpu7x:2x2x1
jax: 0.10.0
libtpu: 0.0.40
codegen_flags: <defaults>
</compile_context>

<pallas_src>
import jax
import jax.numpy as jnp
from jax.experimental import pallas as pl
from jax.experimental.pallas import tpu as pltpu


def mlp_kernel(x_ref, w1_ref, b1_ref, w2_ref, b2_ref, o_ref):
    # [tm, D_in] -> [D_in, tm] on the XLU so the MXU sees a tiny LHS and a
    # lane-dense (batch) RHS / output.
    xT = x_ref[...].T                                                    # [D_in, tm]
    h = jnp.dot(w1_ref[...], xT, preferred_element_type=jnp.float32)    # [H, tm]
    h = jnp.tanh(h + b1_ref[...])                                        # b1 is [H, 1]
    y = jnp.dot(w2_ref[...], h, preferred_element_type=jnp.float32)     # [2, tm]
    o_ref[...] = (y + b2_ref[...]).astype(o_ref.dtype)                   # lane-dense store


def _round_up(a: int, m: int) -> int:
    return ((a + m - 1) // m) * m


def on_top_modeler_forward(x, w1, b1, w2, b2, *, tm=8192, use_bf16=False):
    """Pallas forward for OnTopModeler.

    x  : [B, D_in] float32
    w1 : [H, D_in]   (nn.Linear layout, linear1.weight)
    b1 : [H]
    w2 : [2, H]      (nn.Linear layout, linear2.weight)
    b2 : [2]
    returns [B, 2] float32 logits (pre-sigmoid), matching the PyTorch forward.
    """
    B, D_in = x.shape
    H = w1.shape[0]
    out_dim = w2.shape[0]

    if use_bf16:
        # TODO(synk): precision trade-off (halves x HBM traffic, avoids f32 MXU
        # multi-pass) — breaks the 1e-5 tolerance, so keep off by default.
        x = x.astype(jnp.bfloat16)
        w1 = w1.astype(jnp.bfloat16)

    b1_col = b1.reshape(H, 1).astype(jnp.float32)
    b2_col = b2.reshape(out_dim, 1).astype(jnp.float32)

    # --- batch tile selection ------------------------------------------------
    # MXU-bound workload: use big tiles to amortize the ~0.35 us per-grid-step
    # overhead, but keep >= 4 grid steps when B allows so v7x's two TensorCores
    # each get >= 2 pipelined steps (no effect on single-core v5e/v6e).
    TARGET_STEPS = 4
    if B <= 128:
        tm_eff = B  # single full-extent block; handles ragged tiny batches, no padding
    else:
        tm_eff = min(tm, max(128, _round_up(pl.cdiv(B, TARGET_STEPS), 128)))
    grid = (pl.cdiv(B, tm_eff),)

    out_t = pl.pallas_call(
        mlp_kernel,
        out_shape=jax.ShapeDtypeStruct((out_dim, B), jnp.float32),
        grid_spec=pltpu.PrefetchScalarGridSpec(
            num_scalar_prefetch=0,
            grid=grid,
            in_specs=[
                pl.BlockSpec((tm_eff, D_in), lambda i: (i, 0)),     # x tile (streamed)
                pl.BlockSpec((H, D_in), lambda i: (0, 0)),          # w1 (VMEM-resident)
                pl.BlockSpec((H, 1), lambda i: (0, 0)),             # b1 as column
                pl.BlockSpec((out_dim, H), lambda i: (0, 0)),       # w2 (VMEM-resident)
                pl.BlockSpec((out_dim, 1), lambda i: (0, 0)),       # b2 as column
            ],
            out_specs=pl.BlockSpec((out_dim, tm_eff), lambda i: (0, i)),  # lane-dense [2, tm]
        ),
        compiler_params=pltpu.CompilerParams(
            dimension_semantics=("parallel",),
        ),
    )(x, w1, b1_col, w2, b2_col)

    return out_t.T  # [B, 2]; tiny (8*B byte) wrapper-side transpose


if __name__ == "__main__":
    # Small shapes consistent with the module: input_size=32, hidden_nodes=64.
    D_in, H = 32, 64
    key = jax.random.PRNGKey(0)
    kw1, kb1, kw2, kb2, kx1, kx2, kx3 = jax.random.split(key, 7)

    # Deterministic params mimicking nn.Linear's uniform(-1/sqrt(fan_in), ...),
    # stored in nn.Linear layout ([out_features, in_features]).
    lim1 = 1.0 / (D_in ** 0.5)
    w1 = jax.random.uniform(kw1, (H, D_in), jnp.float32, -lim1, lim1)
    b1 = jax.random.uniform(kb1, (H,), jnp.float32, -lim1, lim1)
    lim2 = 1.0 / (H ** 0.5)
    w2 = jax.random.uniform(kw2, (2, H), jnp.float32, -lim2, lim2)
    b2 = jax.random.uniform(kb2, (2,), jnp.float32, -lim2, lim2)

    def reference_forward(xin):
        h = jnp.tanh(xin @ w1.T + b1)
        return h @ w2.T + b2

    cases = [
        ("aligned", 16, kx1),        # single-step path, 8-aligned batch
        ("ragged-small", 13, kx2),   # single-step path, ragged batch (no padding)
        ("multi-step", 260, kx3),    # cdiv grid with partial last block (OOB writes dropped)
    ]
    for name, B, kx in cases:
        x = jax.random.normal(kx, (B, D_in), dtype=jnp.float32)
        out = jax.block_until_ready(on_top_modeler_forward(x, w1, b1, w2, b2))
        ref = reference_forward(x)
        assert out.shape == (B, 2), f"{name}: bad shape {out.shape}"
        assert jnp.allclose(out, ref, atol=1e-5, rtol=1e-5), f"{name}: mismatch vs reference"

    print("KERNEL_OK")
</pallas_src>

<mosaic_0001>
module attributes {stable_mosaic.version = 11 : i64} {
  func.func @mlp_kernel(%arg0: i32, %arg1: memref<16x32xf32, #tpu.memory_space<vmem>>, %arg2: memref<64x32xf32, #tpu.memory_space<vmem>>, %arg3: memref<64x1xf32, #tpu.memory_space<vmem>>, %arg4: memref<2x64xf32, #tpu.memory_space<vmem>>, %arg5: memref<2x1xf32, #tpu.memory_space<vmem>>, %arg6: memref<2x16xf32, #tpu.memory_space<vmem>>) attributes {dimension_semantics = [#tpu.dimension_semantics<parallel>], iteration_bounds = array<i64: 1>, scalar_prefetch = 0 : i64, scratch_operands = 0 : i64, tpu.core_type = #tpu.core_type<tc>, window_params = [{transform_indices = @transform_0, window_bounds = array<i64: 16, 32>}, {pipeline_mode = #tpu.pipeline_mode<synchronous>, transform_indices = @transform_1, window_bounds = array<i64: 64, 32>}, {pipeline_mode = #tpu.pipeline_mode<synchronous>, transform_indices = @transform_2, window_bounds = array<i64: 64, 1>}, {pipeline_mode = #tpu.pipeline_mode<synchronous>, transform_indices = @transform_3, window_bounds = array<i64: 2, 64>}, {pipeline_mode = #tpu.pipeline_mode<synchronous>, transform_indices = @transform_4, window_bounds = array<i64: 2, 1>}, {transform_indices = @transform_5, window_bounds = array<i64: 2, 16>}]} {
    %c0 = arith.constant 0 : index
    %c0_0 = arith.constant 0 : index
    %0 = vector.load %arg1[%c0, %c0_0] : memref<16x32xf32, #tpu.memory_space<vmem>>, vector<16x32xf32>
    %1 = tpu.transpose %0, [1, 0] : vector<16x32xf32> -> vector<32x16xf32>
    %c0_1 = arith.constant 0 : index
    %c0_2 = arith.constant 0 : index
    %2 = vector.load %arg2[%c0_1, %c0_2] : memref<64x32xf32, #tpu.memory_space<vmem>>, vector<64x32xf32>
    %cst = arith.constant dense<0.000000e+00> : vector<64x16xf32>
    %3 = tpu.matmul %2, %1, %cst {dimension_numbers = #tpu.dot_dimension_numbers<[1], [0], [0], [1], [0, 0, 1, 1], [], []>} : vector<64x32xf32>, vector<32x16xf32>, vector<64x16xf32> -> vector<64x16xf32>
    %c0_3 = arith.constant 0 : index
    %c0_4 = arith.constant 0 : index
    %4 = vector.load %arg3[%c0_3, %c0_4] : memref<64x1xf32, #tpu.memory_space<vmem>>, vector<64x1xf32>
    %5 = vector.broadcast %4 : vector<64x1xf32> to vector<64x16xf32>
    %6 = arith.addf %3, %5 : vector<64x16xf32>
    %7 = math.tanh %6 : vector<64x16xf32>
    %c0_5 = arith.constant 0 : index
    %c0_6 = arith.constant 0 : index
    %8 = vector.load %arg4[%c0_5, %c0_6] : memref<2x64xf32, #tpu.memory_space<vmem>>, vector<2x64xf32>
    %cst_7 = arith.constant dense<0.000000e+00> : vector<2x16xf32>
    %9 = tpu.matmul %8, %7, %cst_7 {dimension_numbers = #tpu.dot_dimension_numbers<[1], [0], [0], [1], [0, 0, 1, 1], [], []>} : vector<2x64xf32>, vector<64x16xf32>, vector<2x16xf32> -> vector<2x16xf32>
    %c0_8 = arith.constant 0 : index
    %c0_9 = arith.constant 0 : index
    %10 = vector.load %arg5[%c0_8, %c0_9] : memref<2x1xf32, #tpu.memory_space<vmem>>, vector<2x1xf32>
    %11 = vector.broadcast %10 : vector<2x1xf32> to vector<2x16xf32>
    %12 = arith.addf %9, %11 : vector<2x16xf32>
    %c0_10 = arith.constant 0 : index
    %c0_11 = arith.constant 0 : index
    %13 = vector.load %arg6[%c0_10, %c0_11] : memref<2x16xf32, #tpu.memory_space<vmem>>, vector<2x16xf32>
    tpu.vector_store %arg6[%c0_10, %c0_11], %12 {strides = array<i32>} : memref<2x16xf32, #tpu.memory_space<vmem>>, vector<2x16xf32>,
    return
  }
  func.func @transform_0(%arg0: i32) -> (i32, i32) {
    %c0_i32 = arith.constant 0 : i32
    %c0_i32_0 = arith.constant 0 : i32
    return %arg0, %c0_i32 : i32, i32
  }
  func.func @transform_1(%arg0: i32) -> (i32, i32) {
    %c0_i32 = arith.constant 0 : i32
    %c0_i32_0 = arith.constant 0 : i32
    %c0_i32_1 = arith.constant 0 : i32
    return %c0_i32, %c0_i32_0 : i32, i32
  }
  func.func @transform_2(%arg0: i32) -> (i32, i32) {
    %c0_i32 = arith.constant 0 : i32
    %c0_i32_0 = arith.constant 0 : i32
    %c0_i32_1 = arith.constant 0 : i32
    return %c0_i32, %c0_i32_0 : i32, i32
  }
  func.func @transform_3(%arg0: i32) -> (i32, i32) {
    %c0_i32 = arith.constant 0 : i32
    %c0_i32_0 = arith.constant 0 : i32
    %c0_i32_1 = arith.constant 0 : i32
    return %c0_i32, %c0_i32_0 : i32, i32
  }
  func.func @transform_4(%arg0: i32) -> (i32, i32) {
    %c0_i32 = arith.constant 0 : i32
    %c0_i32_0 = arith.constant 0 : i32
    %c0_i32_1 = arith.constant 0 : i32
    return %c0_i32, %c0_i32_0 : i32, i32
  }
  func.func @transform_5(%arg0: i32) -> (i32, i32) {
    %c0_i32 = arith.constant 0 : i32
    %c0_i32_0 = arith.constant 0 : i32
    return %c0_i32, %arg0 : i32, i32
  }
}

</mosaic_0001>

<bundles_post_ra>
// kernel: tpu_custom_call.1
= control target key start
LH: loop header
LB: loop body
LE: loop exit
PB: predicated region body
PF: predicated region fallthrough
CT: control target
= control target key end

     0   :  { %vm79_vm0 = vcmask 261120   ;;  %v450_v4 = vmov 0   ;;  %s567_s0 = inlined_call_operand.vmem [shape: f32[16,32], index: 0, kind: input, shape index: {}]   ;;  %s568_s1 = inlined_call_operand.vmem [shape: f32[64,32], index: 1, kind: input, shape index: {}]   ;;  %s569_s2 = inlined_call_operand.vmem [shape: f32[64,1], index: 2, kind: input, shape index: {}]   ;;  %s570_s3 = inlined_call_operand.vmem [shape: f32[2,64], index: 3, kind: input, shape index: {}]   ;;  %s571_s4 = inlined_call_operand.vmem [shape: f32[2,1], index: 4, kind: input, shape index: {}]   ;;  %s572_s5 = inlined_call_operand.hbm [shape: f32[2,16], index: 5, kind: output, shape index: {}]  }
   0x1   :  { %v21_v0 = vld [vmem:[%s567_s0] sm:$0xff]  ;;  %v22_v1 = vld [vmem:[%s567_s0 + $0x8] sm:$0xff]  ;;  %vm386_vm1 = vmpackc.low %vm79_vm0, %vm79_vm0  ;;  %408 = vset.pattern.permute.xlu0 %v450_v4  ;;  %409 = vset.pattern.permute.xlu1 %v450_v4 }
   0x2   :  { %v23_v2 = vld [vmem:[%s568_s1] sm:$0xff]  ;;  %v385_v3 = vpack.c.bf16 %v22_v1, %v21_v0  ;;  %v33_v6 = vld [vmem:[%s569_s2 + $0x10] sm:$0xff]  ;;  %v32_v7 = vld [vmem:[%s569_s2 + $0x8] sm:$0xff] }
   0x3   :  { %354 = vmatprep.mubr.msk.f32.mxu0 %vm79_vm0, %v23_v2  ;;  %v31_v5 = vld [vmem:[%s569_s2] sm:$0xff]  ;;  %51 = vperm.xlu1 %409, %v33_v6   ;;  %v34_v8 = vld [vmem:[%s569_s2 + $0x18] sm:$0xff] }
   0x4   :  { %387 = vmatprep.subr.msk.bf16.mxu0 %vm386_vm1, %v385_v3  ;;  %41 = vperm.xlu0 %408, %v31_v5  }
   0x5   :  { %390 = vmatpush3.bf16.xpose.msk.msra.mxu0 %vm386_vm1, %v385_v3 }
   0x6   :  { %10 = vsyncpa [#allocation3], 0  ;;  %v24_v9 = vld [vmem:[%s568_s1 + $0x8] sm:$0xff]  ;;  %v25_v10 = vld [vmem:[%s568_s1 + $0x10] sm:$0xff]  ;;  %v451_v21 = vmov 0.0|0.0   ;;  %vm452_vm2 = vmmov 0  }
   0x7   :  { %v35_v11 = vld [vmem:[%s569_s2 + $0x20] sm:$0xff]  ;;  %56 = vperm.xlu1 %409, %v34_v8   ;;  %v36_v12 = vld [vmem:[%s569_s2 + $0x28] sm:$0xff]  ;;  %v26_v13 = vld [vmem:[%s568_s1 + $0x18] sm:$0xff]  ;;  %391 = vmatprep.subr.bf16.mxu1 %v451_v21  ;;  %v453_v22 = vmov 0.0   ;;  %vm230_vm3 = vcmask 523264   ;;  %s454_s28 = smov [#allocation2]  }
   0x8   :  { %46 = vperm.xlu0 %408, %v32_v7   ;;  %v27_v14 = vld [vmem:[%s568_s1 + $0x20] sm:$0xff]  ;;  %v37_v15 = vld [vmem:[%s569_s2 + $0x30] sm:$0xff]  ;;  %v38_v16 = vld [vmem:[%s569_s2 + $0x38] sm:$0xff]  ;;  %382 = vmatprep.mubr.msk.f32.mxu1 %vm452_vm2, %v453_v22  ;;  %s312_s29 = sshll.u32 %s454_s28, 4  ;;  %vm304_vm4 = vcmask 123904   ;;  %s313_s29 = int_to_ptr.vmem [resolvable:$true] %s312_s29 }
   0x9   :  { %v28_v17 = vld [vmem:[%s568_s1 + $0x28] sm:$0xff]  ;;  %v29_v18 = vld [vmem:[%s568_s1 + $0x30] sm:$0xff]  ;;  %v224_v19 = vld [vmem:[%s571_s4] sm:$0x3]  ;;  %s426_s30 = scalar_lea.vmem %s313_s29, 32  ;;  %p431_p1 = scmp.lt.s32.totalorder %s313_s29, %s313_s29 }
   0xa   :  { %v30_v20 = vld [vmem:[%s568_s1 + $0x38] sm:$0xff]  ;;  %v223_v59 = vld [vmem:[%s570_s3] sm:$0x3]  ;;  %p427_p0 = scmp.ne.s32.totalorder %s313_s29, %s426_s30  ;;  %p432_p2 = scmp.lt.s32.totalorder %s426_s30, %s426_s30 }
   0xb   :  { %66 = vperm.xlu1 %409, %v36_v12  }
   0xc   :  { %355 = vmatmul.mubr.msk.f32.vlgmr.msra.gmra.mrb[0].mxu0 %vm79_vm0, %v24_v9  ;;  %61 = vperm.xlu0 %408, %v35_v11   ;;  %p433_p3 = por %p432_p2, %p431_p1 }
   0xd   :  { %357 = vmatprep.mubr.msk.f32.mxu0 %vm79_vm0, %v25_v10 }
   0xe   :  { %p434_p4 = pnand %p433_p3, %p427_p0 }
   0xf   :  { %76 = vperm.xlu1 %409, %v38_v16  }
  0x10   :  { %358 = vmatmul.mubr.msk.f32.gmra.mrb[2].mxu0 %vm79_vm0, %v26_v13  ;;  %71 = vperm.xlu0 %408, %v37_v15  }
  0x11   :  { %360 = vmatprep.mubr.msk.f32.mxu0 %vm79_vm0, %v27_v14 }
  0x14   :  { %361 = vmatmul.mubr.msk.f32.gmra.mrb[4].mxu0 %vm79_vm0, %v28_v17  ;;  %227 = vperm.xlu0 %408, %v224_v19  }
  0x15   :  { %363 = vmatprep.mubr.msk.f32.mxu0 %vm79_vm0, %v29_v18 }
  0x18   :  { %364 = vmatmul.mubr.msk.f32.gmra.mrb[6].mxu0 %vm79_vm0, %v30_v20 }
  0x82   :  { %v52_v24 = vpop.permute.xlu1 %51 }
  0x83   :  { %v42_v23 = vpop.permute.xlu0 %41 }
  0x86   :  { %v57_v26 = vpop.permute.xlu1 %56 }
  0x87   :  { %v47_v25 = vpop.permute.xlu0 %46 }
  0x8a   :  { %v67_v34 = vpop.permute.xlu1 %66 }
  0x8b   :  { %v62_v36 = vpop.permute.xlu0 %61 }
  0x8e   :  { %v77_v41 = vpop.permute.xlu1 %76 }
  0x8f   :  { %v72_v44 = vpop.permute.xlu0 %71 }
  0x93   :  { %v228_v60 = vpop.permute.xlu0 %227 }
  0xdf   :  { %v356_v27 = vpop.f32.mrb[0].mxu0 }
  0xe0   :  { %v182_v28 = vadd.f32 %v356_v27, %v47_v25  ;;  %v176_v29 = vpop.f32.mrb[1].mxu0 }
  0xe1   :  { %v177_v30 = vadd.f32 %v176_v29, %v42_v23 }
  0xe2   :  { %410 = vtanh.f32 %v182_v28 }
  0xe3   :  { %412 = vtanh.f32 %v177_v30  ;;  %v359_v31 = vpop.f32.mrb[2].mxu0 }
  0xe4   :  { %v192_v32 = vadd.f32 %v359_v31, %v57_v26  ;;  %v186_v33 = vpop.f32.mrb[3].mxu0 }
  0xe5   :  { %v187_v35 = vadd.f32 %v186_v33, %v52_v24 }
  0xe6   :  { %414 = vtanh.f32 %v192_v32 }
  0xe7   :  { %416 = vtanh.f32 %v187_v35  ;;  %v362_v37 = vpop.f32.mrb[4].mxu0 }
  0xe8   :  { %v202_v38 = vadd.f32 %v362_v37, %v67_v34  ;;  %v196_v39 = vpop.f32.mrb[5].mxu0 }
  0xe9   :  { %v197_v40 = vadd.f32 %v196_v39, %v62_v36 }
  0xea   :  { %418 = vtanh.f32 %v202_v38 }
  0xeb   :  { %420 = vtanh.f32 %v197_v40  ;;  %v365_v42 = vpop.f32.mrb[6].mxu0 }
  0xec   :  { %v411_v43 = vpop.eup %410  ;;  %v212_v45 = vadd.f32 %v365_v42, %v77_v41  ;;  %v206_v46 = vpop.f32.mrb[7].mxu0 }
  0xed   :  { %v413_v47 = vpop.eup %412  ;;  %v207_v48 = vadd.f32 %v206_v46, %v72_v44 }
  0xee   :  { %422 = vtanh.f32 %v212_v45  ;;  %v392_v49 = vpack.c.bf16 %v411_v43, %v413_v47 }
  0xef   :  { %424 = vtanh.f32 %v207_v48 }
  0xf0   :  { %v415_v50 = vpop.eup %414  ;;  %393 = vmatpush3.bf16.msra.mxu1 %v392_v49 }
  0xf1   :  { %v417_v51 = vpop.eup %416  ;;  %394 = vmatprep.subr.bf16.mxu1 %v451_v21 }
  0xf2   :  { %v395_v52 = vpack.c.bf16 %v415_v50, %v417_v51 }
  0xf4   :  { %v419_v53 = vpop.eup %418  ;;  %396 = vmatpush3.bf16.msra.mxu1 %v395_v52 }
  0xf5   :  { %v421_v54 = vpop.eup %420  ;;  %397 = vmatprep.subr.bf16.mxu1 %v451_v21 }
  0xf6   :  { %v398_v55 = vpack.c.bf16 %v419_v53, %v421_v54 }
  0xf8   :  { %v423_v56 = vpop.eup %422  ;;  %399 = vmatpush3.bf16.msra.mxu1 %v398_v55 }
  0xf9   :  { %v425_v57 = vpop.eup %424  ;;  %400 = vmatprep.subr.bf16.mxu1 %v451_v21 }
  0xfa   :  { %v401_v58 = vpack.c.bf16 %v423_v56, %v425_v57 }
  0xfc   :  { %402 = vmatpush3.bf16.msra.mxu1 %v401_v58 }
  0xff   :  { %383 = vmatmul.mubr.msk.f32.vlgmr.msra.gmra.mrb[0].mxu1 %vm230_vm3, %v223_v59 }
 0x1d2   :  { %v300_v61 = vpop.f32.mrb[0].mxu1 }
 0x1d3   :  { %v301_v62 = vadd.f32 %v300_v61, %v228_v60  ;;  %v384_v63 = vpop.f32.mrb[1].mxu1 }
 0x1d5   :  { %305 = vst.msk [vmem:[#allocation2] sm:$0x3] %vm304_vm4, %v301_v62 }
 0x1d6   :  { %437 = shalt.err (!%p434_p4)
}
 0x1d7   :  { %s438_s7 = scalar_lea.hbm %s572_s5, 32 }
 0x1d8   :  { %p439_p5 = scmp.ne.s32.totalorder %s572_s5, %s438_s7  ;;  %p442_p6 = scmp.lt.u32.totalorder %s438_s7, %s572_s5 }
 0x1da   :  { %p444_p7 = pnand %p442_p6, %p439_p5 }
 0x1dc   :  { %447 = shalt.err (!%p444_p7)
}
 0x1dd   :  { %315 = dma.vmem_to_hbm [thread:$0]  %s313_s29, 32, %s572_s5, [#allocation3]  }
 0x1de   :  { %448 = dma.done.wait [#allocation3], 32  }
 0x1df   :  { %449 = vsyncadd [#allocation3], 4294967264 }
 0x1e0   :  { %319 = vsyncpa [#allocation3], 1 }

</bundles_post_ra>
